<compile_context>
chip_gen: v7x
topology: tpu7x:2x2x1
jax: 0.10.0
libtpu: 0.0.40
codegen_flags: <defaults>
</compile_context>

<pallas_src>
import jax
import jax.numpy as jnp
from jax.experimental import pallas as pl
from jax.experimental.pallas import tpu as pltpu

BN_EPS = 1e-5


# --------------------------------------------------------------------------
# Kernel
# --------------------------------------------------------------------------
def _mlp_kernel(x_ref, w1_ref, gamma_ref, beta_ref, w2_ref, b2_ref,
                o_ref, acc_ref):
    c = pl.program_id(0)          # partial-sum split (parallel axis, v7x TCs)
    k = pl.program_id(1)          # hidden tile within this split (reduction)
    nk = pl.num_programs(1)

    # Init accumulator; fold the final bias b2 into split 0's partial sum so
    # the cross-split add outside the kernel stays a plain sum.
    @pl.when(k == 0)
    def _():
        b2v = b2_ref[...].astype(jnp.float32)                    # (1, P)
        init = b2v * (c == 0).astype(jnp.float32)
        acc_ref[...] = jnp.broadcast_to(init, acc_ref.shape)

    # ---- Linear 1 (bias omitted: exactly cancelled by train-mode BN) ----
    h = jnp.dot(x_ref[...], w1_ref[...],
                preferred_element_type=jnp.float32)               # (B, tH) f32

    # ---- BatchNorm1d (training mode): centred two-pass stats -----------
    inv_b = 1.0 / x_ref.shape[0]
    mean = jnp.sum(h, axis=0, keepdims=True) * inv_b              # (1, tH)
    centered = h - mean
    var = jnp.sum(centered * centered, axis=0, keepdims=True) * inv_b
    scale = gamma_ref[...] * jax.lax.rsqrt(var + BN_EPS)          # EUP rsqrt
    h_bn = centered * scale + beta_ref[...]

    # ---- ReLU + Linear 2 partial sum (bf16 MXU inputs, f32 accumulate) --
    h_relu = jnp.maximum(h_bn, 0.0).astype(w2_ref.dtype)
    acc_ref[...] += jnp.dot(h_relu, w2_ref[...],
                            preferred_element_type=jnp.float32)

    @pl.when(k == nk - 1)
    def _():
        o_ref[...] = acc_ref[...].astype(o_ref.dtype)


# --------------------------------------------------------------------------
# Generation-aware sizing helpers
# --------------------------------------------------------------------------
def _detect_tpu():
    """Return (physical VMEM bytes per core, TensorCores per chip)."""
    vmem = None
    try:
        info = pltpu.get_tpu_info()
        v = getattr(info, "vmem_capacity_bytes", None)
        if v:
            vmem = int(v)
    except Exception:
        vmem = None
    kind = ""
    try:
        kind = jax.devices()[0].device_kind.lower()
    except Exception:
        kind = ""
    is_v7 = ("v7" in kind) or ("7x" in kind) or (
        vmem is not None and vmem <= (64 << 20))
    if vmem is None:
        vmem = (64 << 20) if is_v7 else (128 << 20)
    num_tc = 2 if is_v7 else 1
    return vmem, num_tc


def _vmem_footprint(batch, d, p, t_h, wbytes):
    """Per-grid-step VMEM footprint estimate (bytes), incl. f32 temporaries."""
    stream = 2 * batch * d * wbytes          # x block (double-buffered)
    stream += 2 * d * t_h * wbytes           # w1 tile (double-buffered)
    stream += 2 * t_h * p * wbytes           # w2 tile (double-buffered)
    stream += 2 * 2 * t_h * 4                # gamma + beta tiles (f32)
    stream += 2 * p * 4                      # b2 (f32)
    outputs = 2 * batch * p * 4 + batch * p * 4   # out block (dbl) + acc scratch
    inter = 3 * batch * t_h * 4              # h / centred / h_bn-relu live ranges
    return stream + outputs + inter


def _choose_tile_h(h_split, batch, d, p, wbytes, max_tile_h, budget_bytes,
                   min_steps):
    """Largest lane-aligned divisor of h_split whose full footprint (streamed
    tiles + f32 intermediates + outputs) fits the budget, preferring tiles
    that leave >= min_steps reduction steps so the weight DMA stays hidden."""
    fitting = []
    t = 128
    while t <= min(h_split, max_tile_h):
        if (h_split % t == 0 and
                _vmem_footprint(batch, d, p, t, wbytes) <= budget_bytes):
            fitting.append(t)
        t += 128
    preferred = [t for t in fitting if h_split // t >= min_steps]
    if preferred:
        return max(preferred)
    if fitting:
        return max(fitting)
    return 128 if h_split % 128 == 0 else h_split


# --------------------------------------------------------------------------
# Wrapper
# --------------------------------------------------------------------------
def mlp_forward(x, params, *, num_splits=None, max_tile_h=4096, min_steps=3):
    """x: (B, dim) float32. params: see init_mlp_params. Returns (B, proj)."""
    w1, gamma, beta, w2, b2 = (params["w1"], params["gamma"], params["beta"],
                               params["w2"], params["b2"])
    B, D = x.shape
    H, P = w2.shape

    vmem_cap, num_tc = _detect_tpu()
    if num_splits is None:
        num_splits = num_tc                       # 2 only on v7x megacore
    if num_splits < 1 or H % (num_splits * 128) != 0:
        num_splits = 1
    h_split = H // num_splits

    wbytes = w1.dtype.itemsize
    budget = int(vmem_cap * 0.70)                 # ~90 MiB v5e/v6e, ~45 MiB v7x
    tH = _choose_tile_h(h_split, B, D, P, wbytes, max_tile_h, budget, min_steps)
    nk = h_split // tH
    nk_total = num_splits * nk

    # Contiguous per-tile layout for w1: tile t == w1[:, t*tH:(t+1)*tH] stored
    # as one contiguous (D, tH) slab -> single long DMA per grid step instead
    # of D short strided chunks.  (One-time layout transform; do it at
    # weight-load time in production.)
    w1_tiled = w1.reshape(D, nk_total, tH).transpose(1, 0, 2)

    # Stream activations in bf16 as well (halves x DMA; native bf16 MXU path).
    x_in = x.astype(w1.dtype)

    footprint = _vmem_footprint(B, D, P, tH, wbytes)
    vmem_limit = int(min(max(footprint + (8 << 20), 32 << 20),
                         int(vmem_cap * 0.9)))

    # Partials stay f32 across splits; cast after the cross-split sum.
    part_dtype = jnp.float32 if num_splits > 1 else x.dtype

    bytes_accessed = (x_in.size * x_in.dtype.itemsize
                      + w1.size * w1.dtype.itemsize
                      + w2.size * w2.dtype.itemsize
                      + gamma.size * gamma.dtype.itemsize
                      + beta.size * beta.dtype.itemsize
                      + b2.size * b2.dtype.itemsize
                      + num_splits * B * P * jnp.dtype(part_dtype).itemsize)

    partials = pl.pallas_call(
        _mlp_kernel,
        out_shape=jax.ShapeDtypeStruct((num_splits, B, P), part_dtype),
        grid_spec=pltpu.PrefetchScalarGridSpec(
            num_scalar_prefetch=0,
            grid=(num_splits, nk),
            in_specs=[
                pl.BlockSpec((B, D), lambda c, k: (0, 0)),                 # x
                pl.BlockSpec((None, D, tH),
                             lambda c, k: (c * nk + k, 0, 0)),             # w1 tile
                pl.BlockSpec((1, tH), lambda c, k: (0, c * nk + k)),       # gamma
                pl.BlockSpec((1, tH), lambda c, k: (0, c * nk + k)),       # beta
                pl.BlockSpec((tH, P), lambda c, k: (c * nk + k, 0)),       # w2
                pl.BlockSpec((1, P), lambda c, k: (0, 0)),                 # b2
            ],
            out_specs=pl.BlockSpec((None, B, P), lambda c, k: (c, 0, 0)),
            scratch_shapes=[pltpu.VMEM((B, P), jnp.float32)],
        ),
        compiler_params=pltpu.CompilerParams(
            dimension_semantics=("parallel", "arbitrary"),
            vmem_limit_bytes=vmem_limit,
        ),
        cost_estimate=pl.CostEstimate(
            flops=2 * B * (D * H + H * P),
            transcendentals=H,
            bytes_accessed=int(bytes_accessed),
        ),
    )(x_in, w1_tiled, gamma, beta, w2, b2)

    if num_splits == 1:
        return partials[0]
    # Cross-split (per-TensorCore on v7x) f32 partial sums -> final output.
    return jnp.sum(partials, axis=0).astype(x.dtype)


# --------------------------------------------------------------------------
# Params + references
# --------------------------------------------------------------------------
def init_mlp_params(key, dim, hidden_size, projection_size):
    """PyTorch-default init (uniform +-1/sqrt(fan_in) for Linear; BN weight=1,
    bias=0).  Matmul weights stored in bf16 (streamed dtype); BN params and
    biases kept in f32."""
    k1, k2, k3, k4 = jax.random.split(key, 4)
    lim1 = 1.0 / jnp.sqrt(dim)
    lim2 = 1.0 / jnp.sqrt(hidden_size)
    return {
        "w1": jax.random.uniform(k1, (dim, hidden_size), jnp.float32,
                                 -lim1, lim1).astype(jnp.bfloat16),
        # b1 kept only for the module-faithful reference; the kernel drops it
        # because a bias feeding train-mode BatchNorm cancels exactly.
        "b1": jax.random.uniform(k2, (1, hidden_size), jnp.float32,
                                 -lim1, lim1),
        "gamma": jnp.ones((1, hidden_size), jnp.float32),
        "beta": jnp.zeros((1, hidden_size), jnp.float32),
        "w2": jax.random.uniform(k3, (hidden_size, projection_size),
                                 jnp.float32, -lim2, lim2).astype(jnp.bfloat16),
        "b2": jax.random.uniform(k4, (1, projection_size), jnp.float32,
                                 -lim2, lim2),
    }


def mlp_reference_kernel_math(x, params):
    """Pure-JAX mirror of the kernel numerics (bf16 matmul inputs, f32
    accumulation, no Linear-1 bias, centred two-pass BN stats)."""
    w1, w2 = params["w1"], params["w2"]
    h = jnp.dot(x.astype(w1.dtype), w1, preferred_element_type=jnp.float32)
    mean = jnp.mean(h, axis=0, keepdims=True)
    centered = h - mean
    var = jnp.mean(centered * centered, axis=0, keepdims=True)
    scale = params["gamma"] * jax.lax.rsqrt(var + BN_EPS)
    h = jnp.maximum(centered * scale + params["beta"], 0.0).astype(w2.dtype)
    out = jnp.dot(h, w2, preferred_element_type=jnp.float32) + params["b2"]
    return out.astype(x.dtype)


def mlp_reference_module(x, params):
    """f32 PyTorch-module-faithful reference (includes the Linear-1 bias)."""
    w1 = params["w1"].astype(jnp.float32)
    w2 = params["w2"].astype(jnp.float32)
    h = x @ w1 + params["b1"]
    mean = jnp.mean(h, axis=0, keepdims=True)
    var = jnp.mean((h - mean) ** 2, axis=0, keepdims=True)
    h = (h - mean) / jnp.sqrt(var + BN_EPS) * params["gamma"] + params["beta"]
    h = jnp.maximum(h, 0.0)
    return h @ w2 + params["b2"]


# --------------------------------------------------------------------------
# Demo / self-test
# --------------------------------------------------------------------------
if __name__ == "__main__":
    # Small shapes consistent with the module (dim -> hidden -> projection).
    B, DIM, HIDDEN, PROJ = 8, 256, 512, 256

    key = jax.random.PRNGKey(0)
    k_params, k_x = jax.random.split(key)
    params = init_mlp_params(k_params, DIM, HIDDEN, PROJ)
    x = jax.random.normal(k_x, (B, DIM), jnp.float32)

    ref_exact = mlp_reference_kernel_math(x, params)
    ref_module = mlp_reference_module(x, params)

    # 1) Auto config: generation-aware tile / split selection.
    out = jax.block_until_ready(mlp_forward(x, params))
    assert out.shape == (B, PROJ)
    assert jnp.allclose(out, ref_exact, atol=2e-3, rtol=2e-3), \
        "auto config: mismatch vs kernel-math reference"
    assert jnp.allclose(out, ref_module, atol=5e-2, rtol=5e-2), \
        "auto config: mismatch vs f32 module reference"

    # 2) Forced 2-way split + small tiles: exercises both grid axes and the
    #    f32 cross-split partial-sum path regardless of chip generation.
    out2 = jax.block_until_ready(
        mlp_forward(x, params, num_splits=2, max_tile_h=128))
    assert out2.shape == (B, PROJ)
    assert jnp.allclose(out2, ref_exact, atol=2e-3, rtol=2e-3), \
        "split config: mismatch vs kernel-math reference"
    assert jnp.allclose(out2, ref_module, atol=5e-2, rtol=5e-2), \
        "split config: mismatch vs f32 module reference"

    print("KERNEL_OK")
</pallas_src>

<mosaic_0001>
module attributes {stable_mosaic.version = 11 : i64} {
  func.func @_mlp_kernel(%arg0: i32, %arg1: i32, %arg2: memref<8x256xbf16, #tpu.memory_space<vmem>>, %arg3: memref<1x256x128xbf16, #tpu.memory_space<vmem>>, %arg4: memref<1x128xf32, #tpu.memory_space<vmem>>, %arg5: memref<1x128xf32, #tpu.memory_space<vmem>>, %arg6: memref<128x256xbf16, #tpu.memory_space<vmem>>, %arg7: memref<1x256xf32, #tpu.memory_space<vmem>>, %arg8: memref<1x8x256xf32, #tpu.memory_space<vmem>>, %arg9: memref<8x256xf32, #tpu.memory_space<vmem>>) attributes {dimension_semantics = [#tpu.dimension_semantics<parallel>, #tpu.dimension_semantics<arbitrary>], iteration_bounds = array<i64: 1, 4>, scalar_prefetch = 0 : i64, scratch_operands = 1 : i64, tpu.core_type = #tpu.core_type<tc>, window_params = [{pipeline_mode = #tpu.pipeline_mode<synchronous>, transform_indices = @transform_0, window_bounds = array<i64: 8, 256>}, {transform_indices = @transform_1, window_bounds = array<i64: 1, 256, 128>}, {transform_indices = @transform_2, window_bounds = array<i64: 1, 128>}, {transform_indices = @transform_3, window_bounds = array<i64: 1, 128>}, {transform_indices = @transform_4, window_bounds = array<i64: 128, 256>}, {pipeline_mode = #tpu.pipeline_mode<synchronous>, transform_indices = @transform_5, window_bounds = array<i64: 1, 256>}, {transform_indices = @transform_6, window_bounds = array<i64: 1, 8, 256>}]} {
    %c0_i32 = arith.constant 0 : i32
    %0 = arith.cmpi eq, %arg1, %c0_i32 : i32
    %1 = arith.extui %0 : i1 to i32
    %c0_i32_0 = arith.constant 0 : i32
    %2 = arith.cmpi ne, %1, %c0_i32_0 : i32
    scf.if %2 {
      %c0_23 = arith.constant 0 : index
      %c0_24 = arith.constant 0 : index
      %39 = vector.load %arg7[%c0_23, %c0_24] : memref<1x256xf32, #tpu.memory_space<vmem>>, vector<1x256xf32>
      %c0_i32_25 = arith.constant 0 : i32
      %40 = arith.cmpi eq, %arg0, %c0_i32_25 : i32
      %41 = arith.extui %40 : i1 to i32
      %42 = arith.sitofp %41 : i32 to f32
      %43 = vector.broadcast %42 : f32 to vector<1x256xf32>
      %44 = arith.mulf %39, %43 : vector<1x256xf32>
      %45 = vector.shape_cast %44 : vector<1x256xf32> to vector<1x256xf32>
      %46 = vector.broadcast %45 : vector<1x256xf32> to vector<8x256xf32>
      %c0_26 = arith.constant 0 : index
      %c0_27 = arith.constant 0 : index
      %47 = vector.load %arg9[%c0_26, %c0_27] : memref<8x256xf32, #tpu.memory_space<vmem>>, vector<8x256xf32>
      tpu.vector_store %arg9[%c0_26, %c0_27], %46 {strides = array<i32>} : memref<8x256xf32, #tpu.memory_space<vmem>>, vector<8x256xf32>,
    } else {
    }
    %c0 = arith.constant 0 : index
    %c0_1 = arith.constant 0 : index
    %3 = vector.load %arg2[%c0, %c0_1] : memref<8x256xbf16, #tpu.memory_space<vmem>>, vector<8x256xbf16>
    %c0_2 = arith.constant 0 : index
    %c0_3 = arith.constant 0 : index
    %c0_4 = arith.constant 0 : index
    %4 = vector.load %arg3[%c0_2, %c0_3, %c0_4] : memref<1x256x128xbf16, #tpu.memory_space<vmem>>, vector<1x256x128xbf16>
    %5 = vector.shape_cast %4 : vector<1x256x128xbf16> to vector<256x128xbf16>
    %cst = arith.constant dense<0.000000e+00> : vector<8x128xf32>
    %6 = tpu.matmul %3, %5, %cst {dimension_numbers = #tpu.dot_dimension_numbers<[1], [0], [0], [1], [0, 0, 1, 1], [], []>} : vector<8x256xbf16>, vector<256x128xbf16>, vector<8x128xf32> -> vector<8x128xf32>
    %cst_5 = arith.constant dense<0.000000e+00> : vector<128xf32>
    %7 = vector.multi_reduction <add>, %6, %cst_5 [0] : vector<8x128xf32> to vector<128xf32>
    %8 = vector.shape_cast %7 : vector<128xf32> to vector<1x128xf32>
    %cst_6 = arith.constant 1.250000e-01 : f32
    %9 = vector.broadcast %cst_6 : f32 to vector<1x128xf32>
    %10 = arith.mulf %8, %9 : vector<1x128xf32>
    %11 = vector.broadcast %10 : vector<1x128xf32> to vector<8x128xf32>
    %12 = arith.subf %6, %11 : vector<8x128xf32>
    %13 = arith.mulf %12, %12 : vector<8x128xf32>
    %cst_7 = arith.constant dense<0.000000e+00> : vector<128xf32>
    %14 = vector.multi_reduction <add>, %13, %cst_7 [0] : vector<8x128xf32> to vector<128xf32>
    %15 = vector.shape_cast %14 : vector<128xf32> to vector<1x128xf32>
    %cst_8 = arith.constant 1.250000e-01 : f32
    %16 = vector.broadcast %cst_8 : f32 to vector<1x128xf32>
    %17 = arith.mulf %15, %16 : vector<1x128xf32>
    %c0_9 = arith.constant 0 : index
    %c0_10 = arith.constant 0 : index
    %18 = vector.load %arg4[%c0_9, %c0_10] : memref<1x128xf32, #tpu.memory_space<vmem>>, vector<1x128xf32>
    %cst_11 = arith.constant 9.99999974E-6 : f32
    %19 = vector.broadcast %cst_11 : f32 to vector<1x128xf32>
    %20 = arith.addf %17, %19 : vector<1x128xf32>
    %21 = math.rsqrt %20 : vector<1x128xf32>
    %22 = arith.mulf %18, %21 : vector<1x128xf32>
    %23 = vector.broadcast %22 : vector<1x128xf32> to vector<8x128xf32>
    %24 = arith.mulf %12, %23 : vector<8x128xf32>
    %c0_12 = arith.constant 0 : index
    %c0_13 = arith.constant 0 : index
    %25 = vector.load %arg5[%c0_12, %c0_13] : memref<1x128xf32, #tpu.memory_space<vmem>>, vector<1x128xf32>
    %26 = vector.broadcast %25 : vector<1x128xf32> to vector<8x128xf32>
    %27 = arith.addf %24, %26 : vector<8x128xf32>
    %cst_14 = arith.constant 0.000000e+00 : f32
    %28 = vector.broadcast %cst_14 : f32 to vector<8x128xf32>
    %29 = arith.maximumf %27, %28 : vector<8x128xf32>
    %30 = arith.truncf %29 : vector<8x128xf32> to vector<8x128xbf16>
    %c0_15 = arith.constant 0 : index
    %c0_16 = arith.constant 0 : index
    %31 = vector.load %arg9[%c0_15, %c0_16] : memref<8x256xf32, #tpu.memory_space<vmem>>, vector<8x256xf32>
    %c0_17 = arith.constant 0 : index
    %c0_18 = arith.constant 0 : index
    %32 = vector.load %arg6[%c0_17, %c0_18] : memref<128x256xbf16, #tpu.memory_space<vmem>>, vector<128x256xbf16>
    %cst_19 = arith.constant dense<0.000000e+00> : vector<8x256xf32>
    %33 = tpu.matmul %30, %32, %cst_19 {dimension_numbers = #tpu.dot_dimension_numbers<[1], [0], [0], [1], [0, 0, 1, 1], [], []>} : vector<8x128xbf16>, vector<128x256xbf16>, vector<8x256xf32> -> vector<8x256xf32>
    %34 = arith.addf %31, %33 : vector<8x256xf32>
    %c0_20 = arith.constant 0 : index
    %c0_21 = arith.constant 0 : index
    %35 = vector.load %arg9[%c0_20, %c0_21] : memref<8x256xf32, #tpu.memory_space<vmem>>, vector<8x256xf32>
    tpu.vector_store %arg9[%c0_20, %c0_21], %34 {strides = array<i32>} : memref<8x256xf32, #tpu.memory_space<vmem>>, vector<8x256xf32>,
    %c3_i32 = arith.constant 3 : i32
    %36 = arith.cmpi eq, %arg1, %c3_i32 : i32
    %37 = arith.extui %36 : i1 to i32
    %c0_i32_22 = arith.constant 0 : i32
    %38 = arith.cmpi ne, %37, %c0_i32_22 : i32
    scf.if %38 {
      %c0_23 = arith.constant 0 : index
      %c0_24 = arith.constant 0 : index
      %39 = vector.load %arg9[%c0_23, %c0_24] : memref<8x256xf32, #tpu.memory_space<vmem>>, vector<8x256xf32>
      %c0_25 = arith.constant 0 : index
      %c0_26 = arith.constant 0 : index
      %c0_27 = arith.constant 0 : index
      %40 = vector.load %arg8[%c0_25, %c0_26, %c0_27] : memref<1x8x256xf32, #tpu.memory_space<vmem>>, vector<1x8x256xf32>
      %41 = vector.shape_cast %40 : vector<1x8x256xf32> to vector<8x256xf32>
      %42 = vector.shape_cast %39 : vector<8x256xf32> to vector<1x8x256xf32>
      tpu.vector_store %arg8[%c0_25, %c0_26, %c0_27], %42 {strides = array<i32>} : memref<1x8x256xf32, #tpu.memory_space<vmem>>, vector<1x8x256xf32>,
    } else {
    }
    return
  }
  func.func @transform_0(%arg0: i32, %arg1: i32) -> (i32, i32) {
    %c0_i32 = arith.constant 0 : i32
    %c0_i32_0 = arith.constant 0 : i32
    %c0_i32_1 = arith.constant 0 : i32
    return %c0_i32, %c0_i32_0 : i32, i32
  }
  func.func @transform_1(%arg0: i32, %arg1: i32) -> (i32, i32, i32) {
    %c4_i32 = arith.constant 4 : i32
    %0 = arith.muli %arg0, %c4_i32 : i32
    %1 = arith.addi %0, %arg1 : i32
    %c0_i32 = arith.constant 0 : i32
    %c0_i32_0 = arith.constant 0 : i32
    %c0_i32_1 = arith.constant 0 : i32
    return %1, %c0_i32, %c0_i32_0 : i32, i32, i32
  }
  func.func @transform_2(%arg0: i32, %arg1: i32) -> (i32, i32) {
    %c4_i32 = arith.constant 4 : i32
    %0 = arith.muli %arg0, %c4_i32 : i32
    %1 = arith.addi %0, %arg1 : i32
    %c0_i32 = arith.constant 0 : i32
    %c0_i32_0 = arith.constant 0 : i32
    return %c0_i32, %1 : i32, i32
  }
  func.func @transform_3(%arg0: i32, %arg1: i32) -> (i32, i32) {
    %c4_i32 = arith.constant 4 : i32
    %0 = arith.muli %arg0, %c4_i32 : i32
    %1 = arith.addi %0, %arg1 : i32
    %c0_i32 = arith.constant 0 : i32
    %c0_i32_0 = arith.constant 0 : i32
    return %c0_i32, %1 : i32, i32
  }
  func.func @transform_4(%arg0: i32, %arg1: i32) -> (i32, i32) {
    %c4_i32 = arith.constant 4 : i32
    %0 = arith.muli %arg0, %c4_i32 : i32
    %1 = arith.addi %0, %arg1 : i32
    %c0_i32 = arith.constant 0 : i32
    %c0_i32_0 = arith.constant 0 : i32
    return %1, %c0_i32 : i32, i32
  }
  func.func @transform_5(%arg0: i32, %arg1: i32) -> (i32, i32) {
    %c0_i32 = arith.constant 0 : i32
    %c0_i32_0 = arith.constant 0 : i32
    %c0_i32_1 = arith.constant 0 : i32
    return %c0_i32, %c0_i32_0 : i32, i32
  }
  func.func @transform_6(%arg0: i32, %arg1: i32) -> (i32, i32, i32) {
    %c0_i32 = arith.constant 0 : i32
    %c0_i32_0 = arith.constant 0 : i32
    %c0_i32_1 = arith.constant 0 : i32
    return %arg0, %c0_i32, %c0_i32_0 : i32, i32, i32
  }
}

</mosaic_0001>

<bundles_post_ra>
// kernel: tpu_custom_call.1
= control target key start
LH: loop header
LB: loop body
LE: loop exit
PB: predicated region body
PF: predicated region fallthrough
CT: control target
= control target key end

     0   :  { %s1627_s0 = inlined_call_operand.hbm [shape: bf16[8,256], index: 0, kind: input, shape index: {}]   ;;  %s1628_s1 = inlined_call_operand.hbm [shape: bf16[4,256,128], index: 1, kind: input, shape index: {}]   ;;  %s1629_s2 = inlined_call_operand.vmem [shape: f32[1,512], index: 2, kind: input, shape index: {}]   ;;  %s1630_s3 = inlined_call_operand.vmem [shape: f32[1,512], index: 3, kind: input, shape index: {}]   ;;  %s1631_s4 = inlined_call_operand.hbm [shape: bf16[512,256], index: 4, kind: input, shape index: {}]   ;;  %s1632_s5 = inlined_call_operand.vmem [shape: f32[1,256], index: 5, kind: input, shape index: {}]   ;;  %s1633_s6 = inlined_call_operand.hbm [shape: f32[1,8,256], index: 6, kind: output, shape index: {}]  }
   0x1   :  { %1637 = sst [smem:[#allocation13_spill]] %s1628_s1 }
   0x2   :  { %1638 = sst [smem:[#allocation14_spill]] %s1631_s4 }
   0x3   :  { %11 = vsyncpa [#allocation4], 0 }
   0x4   :  { %12 = vsyncpa [#allocation7], 0 }
   0x5   :  { %14 = vsyncpa [#allocation7 + $0x1], 0 }
   0x6   :  { %15 = vsyncpa [#allocation5], 0  ;;  %s1338_s21 = smov 0   ;;  %s1340_s22 = smov 0  }
   0x7   :  { %s1342_s23 = smov 0   ;;  %s1344_s24 = smov 0  }
   0x8   :  { %s1346_s25 = smov 0   ;;  %s1348_s26 = smov 0  }
   0x9 LB: > { %s30_s27 = sadd.s32 1, %s1288_s25  ;;  %s65_s28 = sadd.s32 1, %s1280_s23  ;;  %s1292_s26 = sphi %s1348_s26, %s21_s26   ;;  %s1288_s25 = sphi %s1346_s25, %s1653_s25   ;;  %s1284_s24 = sphi %s1344_s24, %s1652_s24   ;;  %s1280_s23 = sphi %s1342_s23, %s1651_s23   ;;  %s1276_s22 = sphi %s1340_s22, %s1650_s22   ;;  %s1272_s21 = sphi %s1338_s21, %s1649_s21  }
   0xa   : > { %p31_p0 = scmp.ge.s32.totalorder %s30_s27, 4  ;;  %p72_p1 = scmp.ne.s32.totalorder %s1280_s23, %s1276_s22 }
   0xb   : > { %p73_p2 = scmp.eq.s32.totalorder %s1292_s26, 0  ;;  %p1017_p4 = scmp.lt.s32.totalorder %s1292_s26, 4 }
   0xc   : > { %s1655_s27 = smov (%p31_p0, %s30_s27), 0  ;;  %s253_s30 = sand.u32 1, %s1292_s26  }
   0xd   : > { %p74_p3 = por %p73_p2, %p72_p1  ;;  %s62_s29 = ssub.s32 %s1288_s25, %s1655_s27 }
   0xe   : > { %p63_p5 = scmp.eq.s32.totalorder %s62_s29, 0  ;;  %s255_s7 = sand.u32 1, %s1280_s23  }
   0xf   : > { %s968_s8 = sshll.u32 %s1288_s25, 11  ;;  %s1384_s10 = sshll.u32 %s255_s7, 7 }
  0x10   : > { %s1382_s9 = scalar_select %p63_p5, %s1280_s23, %s65_s28  }
  0x11   : > { %s1639_s1 = sld [smem:[#allocation13_spill]]  ;;  %p1393_p6 = pnand %p1017_p4, %p74_p3 }
  0x12   : > { %s257_s15 = scalar_lea.vmem [#allocation6], %s1384_s10  ;;  %s1400_s17 = scalar_lea.sflag [#allocation7], %s253_s30 }
  0x13   : > { %s266_s16 = sshll.u32 %s257_s15, 4  ;;  %p1122_p8 = pneg %p1393_p6  ;;  %s1398_s16 = int_to_ptr.vmem [resolvable:$true] %s266_s16 }
  0x17   : > { %s1391_s13 = scalar_lea.hbm %s1639_s1, %s968_s8  ;;  %s1125_s28 = scalar_lea.hbm %s1639_s1, 8192 }
  0x18   : > { %s1120_s18 = scalar_lea.hbm %s1391_s13, 2048  ;;  %p1126_p11 = scmp.lt.u32.totalorder %s1391_s13, %s1639_s1 }
  0x19   : > { %p1121_p7 = scmp.ne.s32.totalorder %s1391_s13, %s1120_s18  ;;  %p1127_p12 = scmp.lt.u32.totalorder %s1125_s28, %s1120_s18 }
  0x1a   : > { %p1129_p0 = scmp.lt.u32.totalorder %s1120_s18, %s1391_s13 }
  0x1b   : > { %p1123_p9 = pnand %p1122_p8, %p1121_p7  ;;  %p1128_p13 = por %p1127_p12, %p1126_p11 }
  0x1d   : > { %p1124_p10 = pneg %p1123_p9  ;;  %p1130_p1 = por %p1129_p0, %p1128_p13 }
  0x1f   : > { %p1131_p2 = pnand %p1130_p1, %p1124_p10 }
  0x21   : > { %1134 = shalt.err (!%p1131_p2)
}
  0x22   : > { %s1135_s30 = scalar_lea.vmem %s1398_s16, 2048  ;;  %s1294_s11 = smov [#allocation6]  }
  0x23   : > { %p1136_p3 = scmp.ne.s32.totalorder %s1398_s16, %s1135_s30  ;;  %s1140_s12 = sshll.u32 %s1294_s11, 4  ;;  %s1141_s12 = int_to_ptr.vmem [resolvable:$false] %s1140_s12 }
  0x24   : > { %s1142_s15 = scalar_lea.vmem %s1141_s12, 4096  ;;  %p1143_p7 = scmp.lt.s32.totalorder %s1398_s16, %s1141_s12 }
  0x25   : > { %p1138_p4 = pnand %p1136_p3, %p1122_p8  ;;  %p1144_p9 = scmp.lt.s32.totalorder %s1142_s15, %s1135_s30 }
  0x27   : > { %p1139_p5 = pneg %p1138_p4  ;;  %p1145_p11 = por %p1144_p9, %p1143_p7 }
  0x29   : > { %p1146_p12 = pnand %p1145_p11, %p1139_p5 }
  0x2b   : > { %1149 = shalt.err (!%p1146_p12)
}
  0x2c   : > { %s1295_s18 = smov 64   ;;  %s1296_s19 = smov 4  }
  0x2d   : > { %1012 = dma.hbm_to_vmem [thread:$0]  (!%p1393_p6), %s1391_s13, 2048, %s1398_s16, %s1400_s17, %s1295_s18, %s1295_s18, %s1296_s19  }
  0x2e   : > { %s1641_s4 = sld [smem:[#allocation14_spill]]  ;;  %s300_s7 = scalar_lea.vmem [#allocation8], %s1384_s10 }
  0x2f   : > { %s310_s30 = sshll.u32 %s300_s7, 4  ;;  %s1437_s11 = sadd.s32 4294967295, %s1292_s26   ;;  %s1454_s30 = int_to_ptr.vmem [resolvable:$true] %s310_s30 }
  0x30   : > { %p78_p10 = scmp.ne.s32.totalorder %s1276_s22, %s1272_s21  ;;  %p1634_p13 = scmp.eq.s32.totalorder %s1437_s11, 0 }
  0x31   : > { %p913_p0 = scmp.ge.s32.totalorder %s1292_s26, 1  ;;  %p226_p1 = scmp.lt.s32.totalorder %s1292_s26, 5 }
  0x32   : > { %p1446_p2 = por %p1634_p13, %p78_p10  ;;  %s1297_s10 = smov [#allocation3]  }
  0x33   : > { %p1450_p3 = pnand %p913_p0, %p226_p1  ;;  %s239_s16 = sshll.u32 %s1297_s10, 4  ;;  %s1458_s16 = int_to_ptr.vmem [resolvable:$true] %s239_s16 }
  0x34   : > { %s1433_s29 = scalar_lea.hbm %s1641_s4, %s968_s8  ;;  %s1155_s19 = scalar_lea.hbm %s1641_s4, 8192 }
  0x35   : > { %s1642_s13 = scalar_select %p1446_p2, 1, 0 }
  0x36   : > { %s1643_s8 = scalar_select %p1450_p3, 1, 0 }
  0x37   : > { %p1005_p4 = pneg %p1450_p3  ;;  %s1150_s12 = scalar_lea.hbm %s1433_s29, 2048 }
  0x38   : > { %p1151_p7 = scmp.ne.s32.totalorder %s1433_s29, %s1150_s12  ;;  %p1156_p12 = scmp.lt.u32.totalorder %s1433_s29, %s1641_s4 }
  0x39   : > { %p1462_p5 = pnand %p1005_p4, %p1634_p13  ;;  %p1157_p10 = scmp.lt.u32.totalorder %s1155_s19, %s1150_s12 }
  0x3a   : > { %p1153_p9 = pnand %p1151_p7, %p1122_p8  ;;  %p1159_p1 = scmp.lt.u32.totalorder %s1150_s12, %s1433_s29 }
  0x3b   : > { %p1158_p0 = por %p1157_p10, %p1156_p12 }
  0x3c   : > { %p1154_p11 = pneg %p1153_p9 }
  0x3d   : > { %p1160_p4 = por %p1159_p1, %p1158_p0 }
  0x3f   : > { %p1161_p13 = pnand %p1160_p4, %p1154_p11 }
  0x41   : > { %1164 = shalt.err (!%p1161_p13)
}
  0x42   : > { %s1165_s7 = scalar_lea.vmem %s1454_s30, 2048  ;;  %s1298_s10 = smov [#allocation8]  }
  0x43   : > { %p1166_p7 = scmp.ne.s32.totalorder %s1454_s30, %s1165_s7  ;;  %s1170_s15 = sshll.u32 %s1298_s10, 4  ;;  %s1171_s15 = int_to_ptr.vmem [resolvable:$false] %s1170_s15 }
  0x44   : > { %s1172_s18 = scalar_lea.vmem %s1171_s15, 4096  ;;  %p1173_p3 = scmp.lt.s32.totalorder %s1454_s30, %s1171_s15 }
  0x45   : > { %p1168_p9 = pnand %p1166_p7, %p1122_p8  ;;  %p1174_p12 = scmp.lt.s32.totalorder %s1172_s18, %s1165_s7 }
  0x47   : > { %p1169_p2 = pneg %p1168_p9  ;;  %p1175_p10 = por %p1174_p12, %p1173_p3 }
  0x49   : > { %p1176_p0 = pnand %p1175_p10, %p1169_p2 }
  0x4b   : > { %1179 = shalt.err (!%p1176_p0)
}
  0x4c   : > { %s1299_s12 = smov 128   ;;  %s1300_s19 = smov 8  }
  0x4d   : > { %1015 = dma.hbm_to_vmem [thread:$0]  (!%p1393_p6), %s1433_s29, 2048, %s1454_s30, %s1400_s17, %s1299_s12, %s1299_s12, %s1300_s19  }
  0x4e   : > { %s1180_s10 = scalar_lea.hbm %s1627_s0, 128  ;;  %p1182_p13 = pneg %p1462_p5 }
  0x4f   : > { %p1181_p8 = scmp.ne.s32.totalorder %s1627_s0, %s1180_s10  ;;  %p1187_p11 = scmp.lt.u32.totalorder %s1180_s10, %s1627_s0 }
  0x51   : > { %p1183_p2 = pnand %p1182_p13, %p1181_p8 }
  0x53   : > { %p1184_p3 = pneg %p1183_p2 }
  0x55   : > { %p1189_p1 = pnand %p1187_p11, %p1184_p3 }
  0x57   : > { %1192 = shalt.err (!%p1189_p1)
}
  0x58   : > { %s1193_s14 = scalar_lea.vmem %s1458_s16, 128  ;;  %p1201_p9 = scmp.lt.s32.totalorder %s1458_s16, %s1458_s16 }
  0x59   : > { %p1194_p6 = scmp.ne.s32.totalorder %s1458_s16, %s1193_s14  ;;  %p1202_p12 = scmp.lt.s32.totalorder %s1193_s14, %s1193_s14 }
  0x5b   : > { %p1196_p4 = pnand %p1194_p6, %p1182_p13  ;;  %p1203_p10 = por %p1202_p12, %p1201_p9 }
  0x5d   : > { %p1197_p7 = pneg %p1196_p4 }
  0x5f   : > { %p1204_p0 = pnand %p1203_p10, %p1197_p7 }
  0x61   : > { %1207 = shalt.err (!%p1204_p0)
}
  0x62   : > { %1008 = dma.hbm_to_vmem [thread:$0]  (!%p1462_p5), %s1627_s0, 128, %s1458_s16, [#allocation4]  }
  0x63   : > { %p1645_p8 = scmp.ne.s32.totalorder %s1643_s8, 0 }
  0x64   : > { %p1646_p2 = scmp.eq.s32.totalorder (!%p1645_p8), %s1437_s11, 0 }
  0x65   : > { %322 = sbr.rel (%p1645_p8) target bundleno = 680 (0x2a8), region = 44 }
  0x6c   : > { %1259 = dma.done.wait (%p1646_p2), [#allocation4], 128   ;;  %p1647_p13 = pmov %p1646_p2 }
  0x6d   : > { %s328_s17 = sand.u32 1, %s1437_s11   ;;  %s330_s29 = sand.u32 1, %s1276_s22  }
  0x6e   : > { %1261 = vsyncadd (%p1647_p13), [#allocation4], 4294967168  ;;  %s925_s30 = sshll.u32 %s330_s29, 7  ;;  %s329_s21 = scalar_lea.sflag [#allocation7], %s328_s17 }
  0x6f   : > { %s1519_s18 = scalar_lea.vmem [#allocation6], %s925_s30  ;;  %p1648_p3 = scmp.ne.s32.totalorder %s1642_s13, 0 }
  0x71   : > { %1263 = dma.done.wait (%p1648_p3), %s329_s21, 4096  }
  0x72   : > { %1265 = vsyncadd (%p1648_p3), %s329_s21, 4294963200  ;;  %p384_p5 = scmp.lt.s32.totalorder %s1284_s24, 3  ;;  %s1537_s7 = scalar_lea.vmem [#allocation8], %s925_s30 }
  0x73   : > { %p927_p11 = scmp.ne.s32.totalorder %s1284_s24, 0 }
  0x74   : > { %s1527_s8 = scalar_select %p384_p5, %s1284_s24, 3 }
  0x75   : > { %403 = sbr.rel (%p927_p11) target bundleno = 126 (0x7e), region = 60  ;;  %v411_v0 = vlaneseq (!%p927_p11)  ;;  %v404_v2 = vld [vmem:[%s1632_s5] sm:$0x3] (!%p927_p11) }
  0x76   : > { %s386_s19 = scalar_lea.vmem %s1629_s2, %s1527_s8  ;;  %s393_s10 = scalar_lea.vmem %s1630_s3, %s1527_s8 }
  0x77   : > { %v412_v1 = vshrl.u32 (!%p927_p11), %v411_v0, 7 }
  0x79   : > { %v413_v3 = vsub.s32 (!%p927_p11), 0, %v412_v1  ;;  %v417_v4 = vsub.s32 (!%p927_p11), 1, %v412_v1 }
  0x7b   : > { %v414_v5 = vrot.slane (!%p927_p11), %v404_v2, %v413_v3  ;;  %v418_v6 = vrot.slane (!%p927_p11), %v404_v2, %v417_v4 }
  0x7d   : > { %421 = vst [vmem:[#allocation2] sm:$0xff] %v414_v5  ;;  %422 = vst [vmem:[#allocation2 + $0x8] sm:$0xff] %v418_v6 }
  0x7e PF: > { %v1076_v7 = vld [vmem:[%s1519_s18 + $0x40] sm:$0xff]   ;;  %v1078_v9 = vld [vmem:[%s1519_s18 + $0x48] sm:$0xff]   ;;  %v1080_v11 = vld [vmem:[%s1519_s18 + $0x50] sm:$0xff]   ;;  %v1301_v36 = vmov 0   ;;  %v620_v1 = vlaneseq  ;;  %p963_p1 = scmp.ne.s32.totalorder %s1284_s24, 3 }
  0x7f   : > { %v1077_v8 = vld [vmem:[%s1519_s18] sm:$0xff]   ;;  %971 = vmatprep.subr.bf16.mxu0 %v1076_v7  ;;  %v1079_v10 = vld [vmem:[%s1519_s18 + $0x8] sm:$0xff]   ;;  %v1081_v12 = vld [vmem:[%s1519_s18 + $0x10] sm:$0xff]   ;;  %766 = vmatprep.mubr.bf16.mxu1 %v1301_v36 }
  0x80   : > { %972 = vmatpush3.bf16.msra.mxu0 %v1077_v8  ;;  %v1082_v13 = vld [vmem:[%s1519_s18 + $0x58] sm:$0xff]   ;;  %v1084_v15 = vld [vmem:[%s1519_s18 + $0x60] sm:$0xff]   ;;  %v1086_v17 = vld [vmem:[%s1519_s18 + $0x68] sm:$0xff]   ;;  %v621_v2 = vshrl.u32 %v620_v1, 7 }
  0x81   : > { %973 = vmatprep.subr.bf16.mxu0 %v1078_v9  ;;  %v1083_v14 = vld [vmem:[%s1519_s18 + $0x18] sm:$0xff]   ;;  %v1085_v16 = vld [vmem:[%s1519_s18 + $0x20] sm:$0xff]   ;;  %v1087_v19 = vld [vmem:[%s1519_s18 + $0x28] sm:$0xff]  }
  0x82   : > { %v423_v18 = vld [vmem:[#allocation3] sm:$0xff]  ;;  %v1088_v21 = vld [vmem:[%s1519_s18 + $0x70] sm:$0xff]   ;;  %v1094_v26 = vld [vmem:[%s1537_s7 + $0x4] ss:$8 sps:$4 sm:$0xff]   ;;  %v622_v4 = vsub.s32 0, %v621_v2 }
  0x83   : > { %v929_v20 = vcombine.high %v423_v18, %v423_v18  ;;  %v1089_v22 = vld [vmem:[%s1519_s18 + $0x30] sm:$0xff]   ;;  %v1090_v23 = vld [vmem:[%s1519_s18 + $0x78] sm:$0xff]   ;;  %v928_v25 = vcombine.low %v423_v18, %v423_v18  ;;  %v1096_v27 = vld [vmem:[%s1537_s7] ss:$8 sps:$4 sm:$0xff]   ;;  %734 = vmatprep.subr.bf16.mxu1 %v1094_v26 }
  0x84   : > { %974 = vmatpush3.bf16.msra.mxu0 %v1079_v10  ;;  %v1091_v24 = vld [vmem:[%s1519_s18 + $0x38] sm:$0xff]   ;;  %735 = vmatpush1.bf16.msra.mxu1 %v1096_v27  ;;  %v1100_v30 = vld [vmem:[%s1537_s7 + $0x24] ss:$8 sps:$4 sm:$0xff]   ;;  %v1102_v31 = vld [vmem:[%s1537_s7 + $0x20] ss:$8 sps:$4 sm:$0xff]  }
  0x85   : > { %975 = vmatprep.subr.bf16.mxu0 %v1080_v11  ;;  %591 = vmatprep.mubr.bf16.mxu0 %v929_v20  ;;  %v1097_v28 = vld [vmem:[%s1537_s7 + $0x14] ss:$8 sps:$4 sm:$0xff]   ;;  %v1099_v29 = vld [vmem:[%s1537_s7 + $0x10] ss:$8 sps:$4 sm:$0xff]   ;;  %v1106_v34 = vld [vmem:[%s1537_s7 + $0x44] ss:$8 sps:$4 sm:$0xff]  }
  0x86   : > { %736 = vmatprep.subr.bf16.mxu1 %v1097_v28  ;;  %v1103_v32 = vld [vmem:[%s1537_s7 + $0x34] ss:$8 sps:$4 sm:$0xff]   ;;  %v1105_v33 = vld [vmem:[%s1537_s7 + $0x30] ss:$8 sps:$4 sm:$0xff]   ;;  %v1108_v35 = vld [vmem:[%s1537_s7 + $0x40] ss:$8 sps:$4 sm:$0xff]  }
  0x87   : > { %v1109_v37 = vld [vmem:[%s1537_s7 + $0x54] ss:$8 sps:$4 sm:$0xff]   ;;  %v1111_v38 = vld [vmem:[%s1537_s7 + $0x50] ss:$8 sps:$4 sm:$0xff]   ;;  %v1112_v39 = vld [vmem:[%s1537_s7 + $0x64] ss:$8 sps:$4 sm:$0xff]  }
  0x88   : > { %976 = vmatpush3.bf16.msra.mxu0 %v1081_v12  ;;  %737 = vmatpush1.bf16.msra.mxu1 %v1099_v29  ;;  %v1114_v40 = vld [vmem:[%s1537_s7 + $0x60] ss:$8 sps:$4 sm:$0xff]   ;;  %v1115_v41 = vld [vmem:[%s1537_s7 + $0x74] ss:$8 sps:$4 sm:$0xff]   ;;  %v1117_v42 = vld [vmem:[%s1537_s7 + $0x70] ss:$8 sps:$4 sm:$0xff]  }
  0x89   : > { %977 = vmatprep.subr.bf16.mxu0 %v1082_v13  ;;  %738 = vmatprep.subr.bf16.mxu1 %v1100_v30  ;;  %v615_v3 = vld [vmem:[%s386_s19] sm:$0x1] }
  0x8a   : > { %v946_v8 = vld [vmem:[%s393_s10] ss:$0 sm:$0xff] }
  0x8b   : > { %v636_v13 = vld [vmem:[#allocation2] sm:$0xff] }
  0x8c   : > { %978 = vmatpush3.bf16.msra.mxu0 %v1083_v14  ;;  %739 = vmatpush1.bf16.msra.mxu1 %v1102_v31  ;;  %v637_v14 = vld [vmem:[#allocation2 + $0x8] sm:$0xff] }
  0x8d   : > { %979 = vmatprep.subr.bf16.mxu0 %v1084_v15  ;;  %740 = vmatprep.subr.bf16.mxu1 %v1103_v32 }
  0x90   : > { %980 = vmatpush3.bf16.msra.mxu0 %v1085_v16  ;;  %741 = vmatpush1.bf16.msra.mxu1 %v1105_v33 }
  0x91   : > { %981 = vmatprep.subr.bf16.mxu0 %v1086_v17  ;;  %742 = vmatprep.subr.bf16.mxu1 %v1106_v34 }
  0x94   : > { %982 = vmatpush3.bf16.msra.mxu0 %v1087_v19  ;;  %743 = vmatpush1.bf16.msra.mxu1 %v1108_v35 }
  0x95   : > { %983 = vmatprep.subr.bf16.mxu0 %v1088_v21  ;;  %744 = vmatprep.subr.bf16.mxu1 %v1109_v37 }
  0x98   : > { %984 = vmatpush3.bf16.msra.mxu0 %v1089_v22  ;;  %745 = vmatpush1.bf16.msra.mxu1 %v1111_v38 }
  0x99   : > { %985 = vmatprep.subr.bf16.mxu0 %v1090_v23  ;;  %746 = vmatprep.subr.bf16.mxu1 %v1112_v39 }
  0x9c   : > { %986 = vmatpush3.bf16.msra.mxu0 %v1091_v24  ;;  %747 = vmatpush1.bf16.msra.mxu1 %v1114_v40 }
  0x9d   : > { %748 = vmatprep.subr.bf16.mxu1 %v1115_v41 }
  0x9f   : > { %592 = vmatmul.mubr.bf16.vlgmr.msra.gmra.mrb[0].mxu0 %v928_v25 }
  0xa0   : > { %749 = vmatpush1.bf16.msra.mxu1 %v1117_v42 }
 0x172   : > { %v987_v43 = vpop.f32.mrb[0].mxu0 }
 0x173   : > { %v988_v44 = vpop.f32.mrb[1].mxu0 }
 0x174   : > { %v989_v45 = vadd.f32 %v988_v44, %v987_v43  ;;  %v990_v46 = vpop.f32.mrb[2].mxu0 }
 0x175   : > { %v991_v47 = vpop.f32.mrb[3].mxu0 }
 0x176   : > { %v599_v48 = vrot.slane %v989_v45, 4 }
 0x178   : > { %v600_v49 = vadd.f32 %v989_v45, %v599_v48 }
 0x17a   : > { %v601_v50 = vrot.slane %v600_v49, 2 }
 0x17c   : > { %v602_v51 = vadd.f32 %v601_v50, %v600_v49 }
 0x17e   : > { %v603_v52 = vrot.slane %v602_v51, 1 }
 0x180   : > { %v604_v53 = vadd.f32 %v603_v52, %v602_v51 }
 0x182   : > { %v605_v54 = vmul.f32 0.125, %v604_v53 }
 0x184   : > { %v606_v55 = vsub.f32 %v989_v45, %v605_v54 }
 0x186   : > { %v607_v56 = vmul.f32 %v606_v55, %v606_v55 }
 0x188   : > { %v608_v57 = vrot.slane %v607_v56, 4 }
 0x18a   : > { %v609_v58 = vadd.f32 %v608_v57, %v607_v56 }
 0x18c   : > { %v610_v59 = vrot.slane %v609_v58, 2 }
 0x18e   : > { %v611_v60 = vadd.f32 %v610_v59, %v609_v58 }
 0x190   : > { %v612_v61 = vrot.slane %v611_v60, 1 }
 0x192   : > { %v613_v62 = vadd.f32 %v612_v61, %v611_v60 }
 0x194   : > { %v614_v63 = vmul.f32 0.125, %v613_v62 }
 0x196   : > { %v616_v0 = vadd.f32 1e-05, %v614_v63 }
 0x198   : > { %1118 = vrsqrt.f32 %v616_v0 }
 0x1a2   : > { %v1119_v5 = vpop.eup %1118 }
 0x1a3   : > { %v618_v6 = vmul.f32 %v1119_v5, %v615_v3 }
 0x1a5   : > { %v623_v7 = vrot.slane %v618_v6, %v622_v4 }
 0x1a7   : > { %v625_v9 = vmul.f32 %v623_v7, %v606_v55 }
 0x1a9   : > { %v633_v10 = vadd.f32 %v946_v8, %v625_v9 }
 0x1ab   : > { %v634_v11 = vmax.f32 %v633_v10, 0.0 }
 0x1ad   : > { %v635_v12 = vpack.c.bf16 %v634_v11, %v634_v11 }
 0x1af   : > { %767 = vmatmul.mubr.bf16.vlgmr.msra.gmra.mrb[0].mxu1 %v635_v12 }
 0x280   : > { %782 = sbr.rel (%p963_p1) target bundleno = 655 (0x28f), region = 64 }
 0x282   : > { %v768_v15 = vpop.f32.mrb[0].mxu1 }
 0x283   : > { %v775_v16 = vadd.f32 %v768_v15, %v636_v13  ;;  %v770_v17 = vpop.f32.mrb[1].mxu1 }
 0x284   : > { %v776_v18 = vadd.f32 %v770_v17, %v637_v14  ;;  %v772_v19 = vpop.f32.mrb[2].mxu1 }
 0x285   : > { %777 = vst [vmem:[#allocation2] sm:$0xff] %v775_v16  ;;  %v773_v20 = vpop.f32.mrb[3].mxu1 }
 0x286   : > { %778 = vst [vmem:[#allocation2 + $0x8] sm:$0xff] %v776_v18 }
 0x28c   : > { %v783_v21 = vld [vmem:[#allocation2] sm:$0xff] }
 0x28d   : > { %v784_v22 = vld [vmem:[#allocation2 + $0x8] sm:$0xff]  ;;  %785 = vst [vmem:[#allocation9] sm:$0xff] %v783_v21 }
 0x28e   : > { %786 = vst [vmem:[#allocation9 + $0x8] sm:$0xff] %v784_v22 }
 0x28f PF: > { %p1019_p6 = scmp.eq.s32.totalorder %s1437_s11, 3  ;;  %s1302_s29 = smov [#allocation9]  }
 0x290   : > { %s797_s30 = sshll.u32 %s1302_s29, 4  ;;  %s798_s30 = int_to_ptr.vmem [resolvable:$true] %s797_s30 }
 0x291   : > { %s1208_s21 = scalar_lea.vmem %s798_s30, 256  ;;  %p1215_p12 = scmp.lt.s32.totalorder %s798_s30, %s798_s30 }
 0x292   : > { %p1209_p4 = scmp.ne.s32.totalorder %s798_s30, %s1208_s21  ;;  %p1216_p10 = scmp.lt.s32.totalorder %s1208_s21, %s1208_s21 }
 0x294   : > { %p1210_p7 = pnand %p1209_p4, %p1019_p6  ;;  %p1217_p0 = por %p1216_p10, %p1215_p12 }
 0x296   : > { %p1211_p9 = pneg %p1210_p7 }
 0x298   : > { %p1218_p8 = pnand %p1217_p0, %p1211_p9 }
 0x29a   : > { %1221 = shalt.err (!%p1218_p8)
}
 0x29b   : > { %s1222_s8 = scalar_lea.hbm %s1633_s6, 256 }
 0x29c   : > { %p1223_p2 = scmp.ne.s32.totalorder %s1633_s6, %s1222_s8  ;;  %p1228_p5 = scmp.lt.u32.totalorder %s1222_s8, %s1633_s6 }
 0x29e   : > { %p1224_p13 = pnand %p1223_p2, %p1019_p6 }
 0x2a0   : > { %p1225_p3 = pneg %p1224_p13 }
 0x2a2   : > { %p1230_p11 = pnand %p1228_p5, %p1225_p3 }
 0x2a4   : > { %1233 = shalt.err (!%p1230_p11)
}
 0x2a5   : > { %1002 = dma.vmem_to_hbm [thread:$0]  (%p1019_p6), %s798_s30, 256, %s1633_s6, [#allocation5]  }
 0x2a6   : > { %1267 = dma.done.wait (%p1019_p6), [#allocation5], 256  }
 0x2a7   : > { %1269 = vsyncadd (%p1019_p6), [#allocation5], 4294967040 }
 0x2a8 PF: > { %s21_s26 = sadd.s32 1, %s1292_s26   ;;  %s1649_s21 = smov %s1276_s22 }
 0x2a9   : > { %p18_p1 = scmp.ge.s32.totalorder %s21_s26, 6   ;;  %s1650_s22 = smov %s1280_s23 }
 0x2aa   : > { %s1651_s23 = smov %s1382_s9  ;;  %s1652_s24 = smov %s1288_s25 }
 0x2ab   : > { %s1653_s25 = smov %s1655_s27  ;;  %20 = sbr.rel (!%p18_p1) target bundleno = 9 (0x9), region = 112 }
 0x2b2   :  { %810 = vsyncpa [#allocation4], 1 }
 0x2b3   :  { %812 = vsyncpa [#allocation4 + $0x1], 1 }
 0x2b4   :  { %813 = vsyncpa [#allocation7], 1 }
 0x2b5   :  { %815 = vsyncpa [#allocation7 + $0x1], 1 }
 0x2b6   :  { %816 = vsyncpa [#allocation5], 1 }
 0x2b7   :  { %818 = vsyncpa [#allocation5 + $0x1], 1 }

</bundles_post_ra>
